<compile_context>
chip_gen: v7x
topology: tpu7x:2x2x1
jax: 0.10.0
libtpu: 0.0.40
codegen_flags: <defaults>
</compile_context>

<pallas_src>
import functools

import jax
import jax.numpy as jnp
from jax.experimental import pallas as pl
from jax.experimental.pallas import tpu as pltpu


def _vmem_limit_bytes():
    """Explicit scoped-VMEM limit: half of physical VMEM, capped at 64 MiB.

    v5e/v6e (128 MiB physical) -> 64 MiB; v7x (64 MiB physical) -> 32 MiB.
    """
    try:
        cap = int(pltpu.get_tpu_info().vmem_capacity_bytes)
    except Exception:
        cap = 64 << 20  # conservative default (v7x per-TC VMEM)
    return min(cap // 2, 64 << 20)


def _tile_elem_budget(in_dtype, out_dtype, vmem_limit):
    """Max score-tile elements so the per-step working set fits the limit.

    Accounts for double-buffered input/output tiles, the (small) double-
    buffered int8 mask tile, and ~3 full-tile fp32 temporaries that live
    inside the kernel body (x, e, probs).
    """
    in_b = jnp.dtype(in_dtype).itemsize
    out_b = jnp.dtype(out_dtype).itemsize
    per_elem = 2 * (in_b + out_b) + 2 + 12
    budget_bytes = (vmem_limit * 3) // 4      # leave headroom for scalars etc.
    return max(8 * 128, budget_bytes // per_elem)


def _choose_sq_tile(sq, sk, tile_elems):
    """Bounded sq tile: multiple of 8, fits the budget, prefers exact divisors.

    Multiples of 32 are preferred so the int8 mask tile is sublane-pack
    friendly.  If no divisor fits, a bounded tile is returned and the grid
    uses cdiv (partial tail block) -- never the whole sq (v7x-safe).
    """
    if sq * sk <= tile_elems:
        return sq
    max_rows = max(8, (tile_elems // max(sk, 1)) // 8 * 8)
    max_rows = min(max_rows, sq)
    for step in (32, 8):
        best = None
        for t in range(step, max_rows + 1, step):
            if sq % t == 0:
                best = t
        if best is not None:
            return best
    # No dividing tile fits: bounded tile + cdiv grid with a partial tail.
    return min(max_rows, ((sq + 7) // 8) * 8)


def _choose_head_block(n_heads, tsq, sk, tile_elems):
    """Pack several heads per grid step to amortize per-step overhead."""
    best = 1
    for h in range(1, n_heads + 1):
        if n_heads % h == 0 and h * tsq * sk <= tile_elems:
            best = h
    return best


def _scaled_masked_softmax_kernel(x_ref, mask_ref, o_ref, *, scale, approx_recip):
    # x_ref:    (1, h_blk, tsq, sk) scores tile
    # mask_ref: (1, 1,     tsq, sk) int8 mask (nonzero == masked), broadcast
    #           across the heads packed into this tile.
    x = x_ref[...].astype(jnp.float32) * scale
    masked = mask_ref[...] != 0
    # Exact masked_fill numerics: masked logits sit at exactly -10000, and a
    # fully-masked row softmaxes to the uniform 1/sk distribution.
    x = jnp.where(masked, jnp.float32(-10000.0), x)
    x_max = jnp.max(x, axis=-1, keepdims=True)        # XLU cross-lane reduce
    e = jnp.exp(x - x_max)                            # EUP
    denom = jnp.sum(e, axis=-1, keepdims=True)
    if approx_recip:
        probs = e * pl.reciprocal(denom, approx=True)  # EUP vrcp (free slot)
    else:
        probs = e / denom                              # exact for fp32 outputs
    o_ref[...] = probs.astype(o_ref.dtype)


def fused_scale_mask_softmax(inputs, mask, scale, *, in_place=False):
    """inputs: [b, np, sq, sk] (bf16/fp16/fp32); mask: [b, 1, sq, sk] bool.

    Returns softmax probabilities with the same shape/dtype as `inputs`.
    If in_place=True the output aliases the scores buffer (only use when the
    caller does not reuse the raw scores).
    """
    b, n_heads, sq, sk = inputs.shape
    assert mask.shape == (b, 1, sq, sk)

    # Stream the bool mask directly (as int8, 1 B/elem) -- no bias pre-bake,
    # no extra HBM round trip; the cmp/select is free VPU filler in a
    # memory-bound kernel.
    mask_i8 = mask.astype(jnp.int8)

    vmem_limit = _vmem_limit_bytes()
    tile_elems = _tile_elem_budget(inputs.dtype, inputs.dtype, vmem_limit)

    tsq = _choose_sq_tile(sq, sk, tile_elems)
    h_blk = _choose_head_block(n_heads, tsq, sk, tile_elems)
    grid = (b, pl.cdiv(sq, tsq), n_heads // h_blk)

    approx_recip = jnp.dtype(inputs.dtype) != jnp.dtype(jnp.float32)
    kernel = functools.partial(
        _scaled_masked_softmax_kernel, scale=float(scale), approx_recip=approx_recip)

    elems = b * n_heads * sq * sk
    itemsize = jnp.dtype(inputs.dtype).itemsize
    cost = pl.CostEstimate(
        flops=5 * elems,
        transcendentals=elems,
        bytes_accessed=2 * elems * itemsize + b * sq * sk,
    )

    extra = {}
    if in_place:
        extra["input_output_aliases"] = {0: 0}

    out = pl.pallas_call(
        kernel,
        out_shape=jax.ShapeDtypeStruct(inputs.shape, inputs.dtype),
        grid_spec=pltpu.PrefetchScalarGridSpec(
            num_scalar_prefetch=0,
            grid=grid,
            in_specs=[
                # Heads vary fastest (innermost grid axis): the mask block
                # index is unchanged across consecutive steps, so its DMA is
                # skipped and each mask tile is fetched once per
                # (batch, sq-tile) instead of once per head.
                pl.BlockSpec((1, h_blk, tsq, sk),
                             lambda bi, si, hi: (bi, hi, si, 0)),
                pl.BlockSpec((1, 1, tsq, sk),
                             lambda bi, si, hi: (bi, 0, si, 0)),
            ],
            out_specs=pl.BlockSpec((1, h_blk, tsq, sk),
                                   lambda bi, si, hi: (bi, hi, si, 0)),
        ),
        compiler_params=pltpu.CompilerParams(
            # Softmax is fully inside a block (no reduction grid axis); all
            # axes parallel so megacore parts shard the leading axes.
            dimension_semantics=("parallel", "parallel", "parallel"),
            vmem_limit_bytes=int(vmem_limit),
        ),
        cost_estimate=cost,
        **extra,
    )(inputs, mask_i8)

    return out


class FusedScaleMaskSoftmax:
    """JAX/Pallas port of megatron FusedScaleMaskSoftmax (forward only).

    Only the `general` fused path is implemented in the kernel; the causal
    (upper-triangular) case can reuse it by feeding a causal mask.
    """

    def __init__(self, input_in_fp16, input_in_bf16, softmax_in_fp32, scale):
        self.input_in_fp16 = input_in_fp16
        self.input_in_bf16 = input_in_bf16
        self.input_in_float16 = input_in_fp16 or input_in_bf16
        self.softmax_in_fp32 = softmax_in_fp32
        self.scale = scale
        assert self.scale is None or softmax_in_fp32, \
            "softmax should be in fp32 when scaled"

    def __call__(self, inputs, mask):
        assert inputs.ndim == 4
        scale = self.scale if self.scale is not None else 1.0
        return fused_scale_mask_softmax(inputs, mask, scale)


def _reference(inputs, mask, scale):
    x = inputs.astype(jnp.float32) * scale
    x = jnp.where(mask, jnp.float32(-10000.0), x)
    return jax.nn.softmax(x, axis=-1).astype(inputs.dtype)


if __name__ == "__main__":
    key = jax.random.PRNGKey(0)
    k1, k2 = jax.random.split(key)

    b, n_heads, sq, sk = 2, 4, 8, 32
    scale = 0.125  # e.g. 1/sqrt(head_dim)

    inputs = jax.random.normal(k1, (b, n_heads, sq, sk), dtype=jnp.float32)
    inputs = inputs.astype(jnp.bfloat16)  # input_in_bf16
    # Padding-style mask: True == masked out.
    mask = jax.random.bernoulli(k2, p=0.3, shape=(b, 1, sq, sk))
    # Keep at least one unmasked key per row (matches real attention usage).
    mask = mask.at[..., 0].set(False)

    module = FusedScaleMaskSoftmax(
        input_in_fp16=False, input_in_bf16=True,
        softmax_in_fp32=True, scale=scale,
    )

    out = module(inputs, mask)
    out = jax.block_until_ready(out)

    ref = _reference(inputs, mask, scale)
    assert out.shape == inputs.shape and out.dtype == inputs.dtype
    assert jnp.allclose(out.astype(jnp.float32), ref.astype(jnp.float32),
                        atol=2e-2, rtol=2e-2)

    print("KERNEL_OK")
</pallas_src>

<mosaic_0001>
module attributes {stable_mosaic.version = 11 : i64} {
  func.func @_scaled_masked_softmax_kernel(%arg0: i32, %arg1: i32, %arg2: i32, %arg3: memref<1x4x8x32xbf16, #tpu.memory_space<vmem>>, %arg4: memref<1x1x8x32xi8, #tpu.memory_space<vmem>>, %arg5: memref<1x4x8x32xbf16, #tpu.memory_space<vmem>>) attributes {dimension_semantics = [#tpu.dimension_semantics<parallel>, #tpu.dimension_semantics<parallel>, #tpu.dimension_semantics<parallel>], iteration_bounds = array<i64: 2, 1, 1>, scalar_prefetch = 0 : i64, scratch_operands = 0 : i64, tpu.core_type = #tpu.core_type<tc>, window_params = [{transform_indices = @transform_0, window_bounds = array<i64: 1, 4, 8, 32>}, {transform_indices = @transform_1, window_bounds = array<i64: 1, 1, 8, 32>}, {transform_indices = @transform_2, window_bounds = array<i64: 1, 4, 8, 32>}]} {
    %c0 = arith.constant 0 : index
    %c0_0 = arith.constant 0 : index
    %c0_1 = arith.constant 0 : index
    %c0_2 = arith.constant 0 : index
    %0 = vector.load %arg3[%c0, %c0_0, %c0_1, %c0_2] : memref<1x4x8x32xbf16, #tpu.memory_space<vmem>>, vector<1x4x8x32xbf16>
    %1 = arith.extf %0 : vector<1x4x8x32xbf16> to vector<1x4x8x32xf32>
    %cst = arith.constant 1.250000e-01 : f32
    %2 = vector.broadcast %cst : f32 to vector<1x4x8x32xf32>
    %3 = arith.mulf %1, %2 : vector<1x4x8x32xf32>
    %c0_3 = arith.constant 0 : index
    %c0_4 = arith.constant 0 : index
    %c0_5 = arith.constant 0 : index
    %c0_6 = arith.constant 0 : index
    %4 = vector.load %arg4[%c0_3, %c0_4, %c0_5, %c0_6] : memref<1x1x8x32xi8, #tpu.memory_space<vmem>>, vector<1x1x8x32xi8>
    %c0_i8 = arith.constant 0 : i8
    %5 = vector.broadcast %c0_i8 : i8 to vector<1x1x8x32xi8>
    %6 = arith.cmpi ne, %4, %5 : vector<1x1x8x32xi8>
    %cst_7 = arith.constant -1.000000e+04 : f32
    %7 = vector.shape_cast %6 : vector<1x1x8x32xi1> to vector<1x1x8x32xi1>
    %8 = vector.broadcast %7 : vector<1x1x8x32xi1> to vector<1x4x8x32xi1>
    %9 = vector.broadcast %cst_7 : f32 to vector<1x4x8x32xf32>
    %10 = arith.select %8, %9, %3 : vector<1x4x8x32xi1>, vector<1x4x8x32xf32>
    %cst_8 = arith.constant dense<0xFF800000> : vector<1x4x8xf32>
    %11 = vector.multi_reduction <maximumf>, %10, %cst_8 [3] : vector<1x4x8x32xf32> to vector<1x4x8xf32>
    %12 = vector.shape_cast %11 : vector<1x4x8xf32> to vector<1x4x8x1xf32>
    %13 = vector.broadcast %12 : vector<1x4x8x1xf32> to vector<1x4x8x32xf32>
    %14 = arith.subf %10, %13 : vector<1x4x8x32xf32>
    %15 = math.exp %14 : vector<1x4x8x32xf32>
    %cst_9 = arith.constant dense<0.000000e+00> : vector<1x4x8xf32>
    %16 = vector.multi_reduction <add>, %15, %cst_9 [3] : vector<1x4x8x32xf32> to vector<1x4x8xf32>
    %17 = vector.shape_cast %16 : vector<1x4x8xf32> to vector<1x4x8x1xf32>
    %18 = tpu.reciprocal %17 {approx = true} : vector<1x4x8x1xf32> -> vector<1x4x8x1xf32>
    %19 = vector.broadcast %18 : vector<1x4x8x1xf32> to vector<1x4x8x32xf32>
    %20 = arith.mulf %15, %19 : vector<1x4x8x32xf32>
    %21 = arith.truncf %20 : vector<1x4x8x32xf32> to vector<1x4x8x32xbf16>
    %c0_10 = arith.constant 0 : index
    %c0_11 = arith.constant 0 : index
    %c0_12 = arith.constant 0 : index
    %c0_13 = arith.constant 0 : index
    %22 = vector.load %arg5[%c0_10, %c0_11, %c0_12, %c0_13] : memref<1x4x8x32xbf16, #tpu.memory_space<vmem>>, vector<1x4x8x32xbf16>
    tpu.vector_store %arg5[%c0_10, %c0_11, %c0_12, %c0_13], %21 {strides = array<i32>} : memref<1x4x8x32xbf16, #tpu.memory_space<vmem>>, vector<1x4x8x32xbf16>,
    return
  }
  func.func @transform_0(%arg0: i32, %arg1: i32, %arg2: i32) -> (i32, i32, i32, i32) {
    %c0_i32 = arith.constant 0 : i32
    %c0_i32_0 = arith.constant 0 : i32
    return %arg0, %arg2, %arg1, %c0_i32 : i32, i32, i32, i32
  }
  func.func @transform_1(%arg0: i32, %arg1: i32, %arg2: i32) -> (i32, i32, i32, i32) {
    %c0_i32 = arith.constant 0 : i32
    %c0_i32_0 = arith.constant 0 : i32
    %c0_i32_1 = arith.constant 0 : i32
    return %arg0, %c0_i32, %arg1, %c0_i32_0 : i32, i32, i32, i32
  }
  func.func @transform_2(%arg0: i32, %arg1: i32, %arg2: i32) -> (i32, i32, i32, i32) {
    %c0_i32 = arith.constant 0 : i32
    %c0_i32_0 = arith.constant 0 : i32
    return %arg0, %arg2, %arg1, %c0_i32 : i32, i32, i32, i32
  }
}

</mosaic_0001>

<bundles_post_ra>
// kernel: tpu_custom_call.1
= control target key start
LH: loop header
LB: loop body
LE: loop exit
PB: predicated region body
PF: predicated region fallthrough
CT: control target
= control target key end

     0   :  { %7 = vsyncpa [#allocation3], 0  ;;  %s967_s0 = inlined_call_operand.hbm [shape: bf16[2,4,8,32], index: 0, kind: input, shape index: {}]   ;;  %s968_s1 = inlined_call_operand.hbm [shape: s8[2,1,8,32], index: 1, kind: input, shape index: {}]   ;;  %s969_s2 = inlined_call_operand.hbm [shape: bf16[2,4,8,32], index: 2, kind: output, shape index: {}]  }
   0x1   :  { %9 = vsyncpa [#allocation3 + $0x1], 0 }
   0x2   :  { %10 = vsyncpa [#allocation6], 0 }
   0x3   :  { %12 = vsyncpa [#allocation6 + $0x1], 0 }
   0x4   :  { %13 = vsyncpa [#allocation4], 0 }
   0x5   :  { %15 = vsyncpa [#allocation4 + $0x1], 0  ;;  %s734_s9 = smov 0   ;;  %s736_s10 = smov 0  }
   0x6   :  { %s738_s11 = smov 0   ;;  %s740_s12 = smov 0  }
   0x7   :  { %s742_s13 = smov 0   ;;  %s744_s14 = smov 0  }
   0x8 LB: > { %s446_s15 = sadd.s32 4294967295, %s709_s14   ;;  %s447_s16 = sadd.s32 4294967294, %s709_s14   ;;  %s709_s14 = sphi %s744_s14, %s21_s14   ;;  %s705_s13 = sphi %s742_s13, %s988_s13   ;;  %s701_s12 = sphi %s740_s12, %s987_s12   ;;  %s697_s11 = sphi %s738_s11, %s986_s11   ;;  %s693_s10 = sphi %s736_s10, %s985_s10   ;;  %s689_s9 = sphi %s734_s9, %s984_s9  }
   0x9   : > { %s40_s17 = sadd.s32 1, %s705_s13  ;;  %s51_s18 = sadd.s32 1, %s697_s11 }
   0xa   : > { %p42_p0 = scmp.ge.s32.totalorder %s40_s17, 2  ;;  %p58_p1 = scmp.ne.s32.totalorder %s697_s11, %s693_s10 }
   0xb   : > { %p59_p2 = scmp.eq.s32.totalorder %s709_s14, 0  ;;  %p64_p3 = scmp.ne.s32.totalorder %s693_s10, %s689_s9 }
   0xc   : > { %s990_s17 = smov (%p42_p0, %s40_s17), 0  ;;  %p65_p5 = scmp.eq.s32.totalorder %s446_s15, 0 }
   0xd   : > { %p775_p4 = por %p59_p2, %p58_p1  ;;  %s44_s20 = ssub.s32 %s705_s13, %s990_s17 }
   0xe   : > { %p120_p6 = scmp.eq.s32.totalorder %s446_s15, 1  ;;  %p49_p7 = scmp.eq.s32.totalorder %s44_s20, 0 }
   0xf   : > { %p781_p8 = por %p65_p5, %p64_p3  ;;  %p126_p10 = scmp.eq.s32.totalorder %s447_s16, 1 }
  0x10   : > { %p785_p9 = por %p120_p6, %p58_p1  ;;  %p492_p13 = scmp.lt.s32.totalorder %s709_s14, 2 }
  0x11   : > { %s973_s21 = scalar_select %p781_p8, 1, 0 }
  0x12   : > { %s974_s22 = scalar_select %p785_p9, 1, 0 }
  0x13   : > { %s790_s23 = scalar_select %p49_p7, %s697_s11, %s51_s18  }
  0x14   : > { %p792_p11 = por %p126_p10, %p64_p3  ;;  %s799_s25 = sand.u32 1, %s697_s11  }
  0x15   : > { %s450_s26 = sshll.u32 %s799_s25, 4  ;;  %s464_s27 = sshll.u32 %s705_s13, 8 }
  0x16   : > { %s975_s24 = scalar_select %p792_p11, 1, 0 }
  0x17   : > { %s806_s30 = scalar_lea.hbm %s967_s0, %s464_s27  ;;  %s150_s3 = scalar_lea.vmem [#allocation2], %s450_s26 }
  0x18   : > { %s160_s4 = sshll.u32 %s150_s3, 4  ;;  %p812_p0 = pnand %p492_p13, %p775_p4  ;;  %s808_s4 = int_to_ptr.vmem [resolvable:$true] %s160_s4 }
  0x19   : > { %s147_s6 = scalar_lea.sflag [#allocation3], %s799_s25  ;;  %s563_s7 = scalar_lea.hbm %s806_s30, 256 }
  0x1a   : > { %p564_p2 = scmp.ne.s32.totalorder %s806_s30, %s563_s7  ;;  %p565_p3 = pneg %p812_p0 }
  0x1b   : > { %s568_s16 = scalar_lea.hbm %s967_s0, 512  ;;  %p569_p4 = scmp.lt.u32.totalorder %s806_s30, %s967_s0 }
  0x1c   : > { %p566_p5 = pnand %p565_p3, %p564_p2  ;;  %p570_p7 = scmp.lt.u32.totalorder %s568_s16, %s563_s7 }
  0x1d   : > { %p572_p13 = scmp.lt.u32.totalorder %s563_s7, %s806_s30 }
  0x1e   : > { %p567_p6 = pneg %p566_p5  ;;  %p571_p10 = por %p570_p7, %p569_p4 }
  0x20   : > { %p573_p12 = por %p572_p13, %p571_p10 }
  0x22   : > { %p574_p1 = pnand %p573_p12, %p567_p6 }
  0x24   : > { %577 = shalt.err (!%p574_p1)
}
  0x25   : > { %s578_s20 = scalar_lea.vmem %s808_s4, 256  ;;  %s711_s26 = smov [#allocation2]  }
  0x26   : > { %p579_p2 = scmp.ne.s32.totalorder %s808_s4, %s578_s20  ;;  %s583_s27 = sshll.u32 %s711_s26, 4  ;;  %s584_s27 = int_to_ptr.vmem [resolvable:$false] %s583_s27 }
  0x27   : > { %s585_s28 = scalar_lea.vmem %s584_s27, 512  ;;  %p586_p9 = scmp.lt.s32.totalorder %s808_s4, %s584_s27 }
  0x28   : > { %p581_p5 = pnand %p579_p2, %p565_p3  ;;  %p587_p4 = scmp.lt.s32.totalorder %s585_s28, %s578_s20 }
  0x2a   : > { %p582_p11 = pneg %p581_p5  ;;  %p588_p7 = por %p587_p4, %p586_p9 }
  0x2c   : > { %p589_p10 = pnand %p588_p7, %p582_p11 }
  0x2e   : > { %592 = shalt.err (!%p589_p10)
}
  0x2f   : > { %s712_s29 = smov 64   ;;  %s713_s3 = smov 4  }
  0x30   : > { %484 = dma.hbm_to_vmem [thread:$0]  (!%p812_p0), %s806_s30, 256, %s808_s4, %s147_s6, %s712_s29, %s712_s29, %s713_s3  }
  0x31   : > { %p187_p12 = scmp.lt.s32.totalorder %s709_s14, 3  ;;  %s453_s7 = sshll.u32 %s799_s25, 1 }
  0x32   : > { %s454_s8 = sshll.u32 %s705_s13, 5  ;;  %p977_p9 = scmp.ge.s32.totalorder %s709_s14, 1 }
  0x33   : > { %s857_s19 = scalar_lea.hbm %s968_s1, %s454_s8  ;;  %s174_s20 = scalar_lea.vmem [#allocation5], %s453_s7 }
  0x34   : > { %p850_p11 = pnand %p977_p9, %p187_p12  ;;  %s182_s26 = sshll.u32 %s174_s20, 4  ;;  %s183_s26 = int_to_ptr.vmem [resolvable:$true] %s182_s26 }
  0x35   : > { %s171_s30 = scalar_lea.sflag [#allocation6], %s799_s25  ;;  %s593_s4 = scalar_lea.hbm %s857_s19, 32 }
  0x36   : > { %s978_s15 = scalar_select %p850_p11, 1, 0 }
  0x37   : > { %p594_p1 = scmp.ne.s32.totalorder %s857_s19, %s593_s4  ;;  %s598_s28 = scalar_lea.hbm %s968_s1, 64 }
  0x38   : > { %p599_p2 = scmp.lt.u32.totalorder %s857_s19, %s968_s1  ;;  %p600_p5 = scmp.lt.u32.totalorder %s598_s28, %s593_s4 }
  0x39   : > { %p596_p6 = pnand %p594_p1, %p565_p3  ;;  %p602_p7 = scmp.lt.u32.totalorder %s593_s4, %s857_s19 }
  0x3a   : > { %p601_p4 = por %p600_p5, %p599_p2 }
  0x3b   : > { %p597_p13 = pneg %p596_p6 }
  0x3c   : > { %p603_p10 = por %p602_p7, %p601_p4 }
  0x3e   : > { %p604_p12 = pnand %p603_p10, %p597_p13 }
  0x40   : > { %607 = shalt.err (!%p604_p12)
}
  0x41   : > { %s608_s25 = scalar_lea.vmem %s183_s26, 32  ;;  %s714_s7 = smov [#allocation5]  }
  0x42   : > { %p609_p9 = scmp.ne.s32.totalorder %s183_s26, %s608_s25  ;;  %s613_s8 = sshll.u32 %s714_s7, 4  ;;  %s614_s8 = int_to_ptr.vmem [resolvable:$false] %s613_s8 }
  0x43   : > { %s615_s16 = scalar_lea.vmem %s614_s8, 64  ;;  %p616_p8 = scmp.lt.s32.totalorder %s183_s26, %s614_s8 }
  0x44   : > { %p611_p1 = pnand %p609_p9, %p565_p3  ;;  %p617_p11 = scmp.lt.s32.totalorder %s615_s16, %s608_s25 }
  0x46   : > { %p612_p6 = pneg %p611_p1  ;;  %p618_p2 = por %p617_p11, %p616_p8 }
  0x48   : > { %p619_p5 = pnand %p618_p2, %p612_p6 }
  0x4a   : > { %622 = shalt.err (!%p619_p5)
}
  0x4b   : > { %487 = dma.hbm_to_vmem [thread:$0]  (!%p812_p0), %s857_s19, 32, %s183_s26, %s171_s30  }
  0x4c   : > { %p979_p13 = scmp.ne.s32.totalorder %s978_s15, 0 }
  0x4d   : > { %s882_s18 = sand.u32 (!%p979_p13), 1, %s693_s10   ;;  %p980_p8 = scmp.ne.s32.totalorder (!%p979_p13), %s973_s21, 0 }
  0x4e   : > { %191 = sbr.rel (%p979_p13) target bundleno = 436 (0x1b4), region = 28  ;;  %s456_s20 = sshll.u32 (!%p979_p13), %s882_s18, 4 }
  0x4f   : > { %s194_s4 = scalar_lea.sflag (!%p979_p13), [#allocation3], %s882_s18  ;;  %s197_s6 = scalar_lea.vmem (!%p979_p13), [#allocation2], %s456_s20 }
  0x55   : > { %676 = dma.done.wait (%p980_p8), %s194_s4, 256  }
  0x56   : > { %678 = vsyncadd (%p980_p8), %s194_s4, 4294967040  ;;  %s457_s5 = sshll.u32 %s882_s18, 1  ;;  %s203_s15 = scalar_lea.sflag [#allocation6], %s882_s18 }
  0x57   : > { %s206_s19 = scalar_lea.vmem [#allocation5], %s457_s5 }
  0x58   : > { %680 = dma.done.wait (%p980_p8), %s203_s15, 32  }
  0x59   : > { %682 = vsyncadd (%p980_p8), %s203_s15, 4294967264  ;;  %v467_v0 = vld [vmem:[%s197_s6] sm:$0xff]   ;;  %v474_v2 = vld [vmem:[%s197_s6 + $0x8] sm:$0xff]   ;;  %v715_v6 = vmov 0   ;;  %vm259_vm1 = vcmask 261120   ;;  %vm308_vm3 = vcmask 257024  }
  0x5a   : > { %v248_v1 = vld [vmem:[%s206_s19] sm:$0x3]  ;;  %v468_v3 = vunpack.c.l.bf16 %v467_v0  ;;  %v472_v4 = vunpack.c.l.bf16 %v474_v2  ;;  %v469_v5 = vunpack.c.h.bf16 %v467_v0  ;;  %v473_v8 = vunpack.c.h.bf16 %v474_v2  ;;  %s231_s21 = scalar_lea.vmem [#allocation7], %s456_s20  ;;  %s465_s26 = sshll.u32 %s701_s12, 8 }
  0x5b   : > { %vm249_vm0 = vnez %v248_v1  ;;  %s330_s30 = sshll.u32 %s231_s21, 4  ;;  %s915_s29 = scalar_lea.hbm %s969_s2, %s465_s26  ;;  %s917_s30 = int_to_ptr.vmem [resolvable:$true] %s330_s30 }
  0x5c   : > { %v250_v7 = vsel %vm249_vm0, 16843009, %v715_v6  ;;  %v244_v9 = vmul.f32 0.125, %v468_v3  ;;  %v246_v11 = vmul.f32 0.125, %v472_v4  ;;  %v245_v12 = vmul.f32 0.125, %v469_v5  ;;  %s314_s12 = scalar_lea.sflag [#allocation4], %s882_s18 }
  0x5d   : > { %v251_v10 = vunpack.c.0.s8 %v250_v7  ;;  %v247_v13 = vmul.f32 0.125, %v473_v8  ;;  %s623_s3 = scalar_lea.vmem %s917_s30, 256  ;;  %p981_p3 = scmp.ne.s32.totalorder %s974_s22, 0 }
  0x5e   : > { %p624_p0 = scmp.ne.s32.totalorder %s917_s30, %s623_s3  ;;  %s716_s25 = smov [#allocation7]  }
  0x5f   : > { %vm252_vm2 = vcmp.ne.s32.totalorder %v251_v10, 0  ;;  %s627_s7 = sshll.u32 %s716_s25, 4  ;;  %s628_s7 = int_to_ptr.vmem [resolvable:$false] %s627_s7 }
  0x60   : > { %v255_v14 = vsel %vm252_vm2, -10000.0, %v244_v9  ;;  %v257_v15 = vsel %vm252_vm2, -10000.0, %v246_v11  ;;  %v256_v16 = vsel %vm252_vm2, -10000.0, %v245_v12  ;;  %v258_v17 = vsel %vm252_vm2, -10000.0, %v247_v13  ;;  %p625_p11 = pnand %p624_p0, %p981_p3  ;;  %s629_s8 = scalar_lea.vmem %s628_s7, 512 }
  0x61   : > { %v260_v18 = vsel %vm259_vm1, %v255_v14, -inf  ;;  %v266_v19 = vsel %vm259_vm1, %v257_v15, -inf  ;;  %v263_v20 = vsel %vm259_vm1, %v256_v16, -inf  ;;  %v269_v21 = vsel %vm259_vm1, %v258_v17, -inf  ;;  %p630_p7 = scmp.lt.s32.totalorder %s917_s30, %s628_s7  ;;  %p631_p10 = scmp.lt.s32.totalorder %s629_s8, %s623_s3 }
  0x62   : > { %261 = vmax.xlane.f32.xlu0 %v260_v18  ;;  %267 = vmax.xlane.f32.xlu1 %v266_v19  ;;  %p626_p4 = pneg %p625_p11 }
  0x63   : > { %p632_p12 = por %p631_p10, %p630_p7 }
  0x65   : > { %p633_p9 = pnand %p632_p12, %p626_p4 }
  0x66   : > { %264 = vmax.xlane.f32.xlu0 %v263_v20  ;;  %270 = vmax.xlane.f32.xlu1 %v269_v21 }
  0xef   : > { %v262_v22 = vpop.xlane.xlu0 %261  ;;  %v268_v23 = vpop.xlane.xlu1 %267 }
  0xf0   : > { %v272_v24 = vsub.f32 %v255_v14, %v262_v22  ;;  %v274_v25 = vsub.f32 %v257_v15, %v268_v23 }
  0xf2   : > { %v276_v26 = vmul.f32 1.442695, %v272_v24  ;;  %v280_v27 = vmul.f32 1.442695, %v274_v25 }
  0xf3   : > { %v265_v28 = vpop.xlane.xlu0 %264  ;;  %v271_v29 = vpop.xlane.xlu1 %270 }
  0xf4   : > { %547 = vpow2.f32 %v276_v26  ;;  %v273_v30 = vsub.f32 %v256_v16, %v265_v28  ;;  %v275_v31 = vsub.f32 %v258_v17, %v271_v29 }
  0xf5   : > { %549 = vpow2.f32 %v280_v27 }
  0xf6   : > { %v278_v32 = vmul.f32 1.442695, %v273_v30  ;;  %v282_v33 = vmul.f32 1.442695, %v275_v31 }
  0xf8   : > { %551 = vpow2.f32 %v278_v32 }
  0xf9   : > { %553 = vpow2.f32 %v282_v33 }
  0xfe   : > { %v548_v34 = vpop.eup %547 }
  0xff   : > { %v550_v35 = vpop.eup %549  ;;  %v284_v36 = vsel %vm259_vm1, %v548_v34, 0.0 }
 0x100   : > { %285 = vadd.xlane.f32.xlu0 %v284_v36  ;;  %v290_v37 = vsel %vm259_vm1, %v550_v35, 0.0 }
 0x102   : > { %v552_v38 = vpop.eup %551 }
 0x103   : > { %v554_v39 = vpop.eup %553  ;;  %v287_v40 = vsel %vm259_vm1, %v552_v38, 0.0 }
 0x104   : > { %291 = vadd.xlane.f32.xlu0 %v290_v37  ;;  %288 = vadd.xlane.f32.xlu1 %v287_v40  ;;  %v293_v41 = vsel %vm259_vm1, %v554_v39, 0.0 }
 0x108   : > { %294 = vadd.xlane.f32.xlu1 %v293_v41 }
 0x18d   : > { %v286_v42 = vpop.xlane.xlu0 %285 }
 0x18e   : > { %555 = vrcp.f32 %v286_v42 }
 0x191   : > { %v289_v43 = vpop.xlane.xlu1 %288  ;;  %v292_v44 = vpop.xlane.xlu0 %291 }
 0x192   : > { %557 = vrcp.f32 %v289_v43 }
 0x193   : > { %559 = vrcp.f32 %v292_v44 }
 0x195   : > { %v295_v45 = vpop.xlane.xlu1 %294 }
 0x196   : > { %561 = vrcp.f32 %v295_v45 }
 0x198   : > { %v556_v46 = vpop.eup %555 }
 0x199   : > { %v300_v47 = vmul.f32 %v556_v46, %v548_v34 }
 0x19b   : > { %v304_v48 = vpack.c.bf16 %v300_v47, %v300_v47 }
 0x19c   : > { %v558_v49 = vpop.eup %557 }
 0x19d   : > { %v560_v50 = vpop.eup %559  ;;  %309 = vst.msk [vmem:[%s231_s21] sm:$0xf] %vm308_vm3, %v304_v48  ;;  %v301_v51 = vmul.f32 %v558_v49, %v552_v38 }
 0x19e   : > { %v302_v52 = vmul.f32 %v560_v50, %v550_v35 }
 0x19f   : > { %v305_v53 = vpack.c.bf16 %v301_v51, %v301_v51 }
 0x1a0   : > { %v562_v54 = vpop.eup %561  ;;  %v306_v55 = vpack.c.bf16 %v302_v52, %v302_v52 }
 0x1a1   : > { %310 = vst.msk [vmem:[%s231_s21 + $0x4] sm:$0xf] %vm308_vm3, %v305_v53  ;;  %v303_v56 = vmul.f32 %v562_v54, %v554_v39 }
 0x1a2   : > { %311 = vst.msk [vmem:[%s231_s21 + $0x8] sm:$0xf] %vm308_vm3, %v306_v55 }
 0x1a3   : > { %v307_v57 = vpack.c.bf16 %v303_v56, %v303_v56 }
 0x1a5   : > { %312 = vst.msk [vmem:[%s231_s21 + $0xc] sm:$0xf] %vm308_vm3, %v307_v57 }
 0x1a6   : > { %636 = shalt.err (!%p633_p9)
}
 0x1a7   : > { %s637_s16 = scalar_lea.hbm %s915_s29, 256  ;;  %s641_s6 = scalar_lea.hbm %s969_s2, 512 }
 0x1a8   : > { %p638_p1 = scmp.ne.s32.totalorder %s915_s29, %s637_s16  ;;  %p642_p5 = scmp.lt.u32.totalorder %s915_s29, %s969_s2 }
 0x1a9   : > { %p643_p13 = scmp.lt.u32.totalorder %s641_s6, %s637_s16  ;;  %p645_p0 = scmp.lt.u32.totalorder %s637_s16, %s915_s29 }
 0x1aa   : > { %p639_p6 = pnand %p638_p1, %p981_p3 }
 0x1ab   : > { %p644_p8 = por %p643_p13, %p642_p5 }
 0x1ac   : > { %p640_p2 = pneg %p639_p6 }
 0x1ad   : > { %p646_p11 = por %p645_p0, %p644_p8 }
 0x1af   : > { %p647_p4 = pnand %p646_p11, %p640_p2 }
 0x1b1   : > { %650 = shalt.err (!%p647_p4)
}
 0x1b2   : > { %s717_s19 = smov 64   ;;  %s718_s21 = smov 4  }
 0x1b3   : > { %479 = dma.vmem_to_hbm [thread:$0]  (%p981_p3), %s917_s30, 256, %s915_s29, %s314_s12, %s717_s19, %s717_s19, %s718_s21  }
 0x1b4 PF: > { %s345_s26 = sand.u32 1, %s689_s9   ;;  %p982_p7 = scmp.ne.s32.totalorder %s975_s24, 0 }
 0x1b5   : > { %p983_p10 = scmp.ge.s32.totalorder %s709_s14, 2  ;;  %s346_s27 = scalar_lea.sflag [#allocation4], %s345_s26 }
 0x1b7   : > { %p489_p12 = pnand %p983_p10, %p982_p7 }
 0x1b9   : > { %684 = dma.done.wait (!%p489_p12), %s346_s27, 256  }
 0x1ba   : > { %686 = vsyncadd (!%p489_p12), %s346_s27, 4294967040  ;;  %s21_s14 = sadd.s32 1, %s709_s14   ;;  %s984_s9 = smov %s693_s10 }
 0x1bb   : > { %p18_p9 = scmp.ge.s32.totalorder %s21_s14, 4   ;;  %s985_s10 = smov %s697_s11 }
 0x1bc   : > { %s986_s11 = smov %s790_s23  ;;  %s987_s12 = smov %s705_s13 }
 0x1bd   : > { %s988_s13 = smov %s990_s17  ;;  %20 = sbr.rel (!%p18_p9) target bundleno = 8 (0x8), region = 86 }
 0x1c4   :  { %351 = vsyncpa [#allocation3], 1 }
 0x1c5   :  { %353 = vsyncpa [#allocation3 + $0x1], 1 }
 0x1c6   :  { %354 = vsyncpa [#allocation6], 1 }
 0x1c7   :  { %356 = vsyncpa [#allocation6 + $0x1], 1 }
 0x1c8   :  { %357 = vsyncpa [#allocation4], 1 }
 0x1c9   :  { %359 = vsyncpa [#allocation4 + $0x1], 1 }

</bundles_post_ra>
